<compile_context>
chip_gen: v6e
topology: v6e:2x2x1
jax: 0.10.0
libtpu: 0.0.40
codegen_flags: <defaults>
</compile_context>

<pallas_src>
import functools

import jax
import jax.numpy as jnp
from jax import lax
from jax.experimental import pallas as pl
from jax.experimental.pallas import tpu as pltpu

LANE = 128
SUBLANE = 8


def _round_up(n, m):
    return ((n + m - 1) // m) * m


def _rnn_rollout_kernel(x_ref, h0_ref, w_ref, b_ref, y_ref, h_sc):
    # grid = (batch_blocks [parallel], time_chunks [arbitrary / sequential]).
    # Weights / bias use constant index_maps -> DMA'd once, VMEM-resident.
    # The hidden state is carried in a VMEM scratch across the time axis and
    # re-initialized from h0 at the start of every batch block.
    @pl.when(pl.program_id(1) == 0)
    def _init():
        h_sc[...] = h0_ref[...].astype(jnp.float32)

    w = w_ref[...]
    b = b_ref[...]                       # (1, K) f32, broadcasts over batch
    t_chunk = x_ref.shape[0]

    def step(t, h):
        # x occupies lanes [0:IN], h lanes [IN:IN+H], zeros elsewhere, so
        # packing [x | h] is one full-vreg VPU add (no concat / lane shuffle).
        xh = x_ref[t].astype(jnp.float32) + h
        z = jnp.dot(xh.astype(w.dtype), w, preferred_element_type=jnp.float32)
        h_new = jnp.tanh(z + b)          # pad lanes stay exactly 0 == tanh(0)
        y_ref[t] = h_new.astype(y_ref.dtype)
        return h_new

    h_sc[...] = lax.fori_loop(0, t_chunk, step, h_sc[...], unroll=True)


def rnn_rollout_pallas(x_seq_p, h0_p, w, b, *, t_chunk, b_tile):
    """Fused rollout over padded/packed operands.

    x_seq_p: (T_pad, B_pad, K)   x packed in lanes [0:IN]
    h0_p   : (B_pad, K)          h packed in lanes [IN:IN+H]
    w      : (K, K)              W_ih rows [0:IN], W_hh rows [IN:IN+H], cols [IN:IN+H]
    b      : (1, K) float32      bias packed in lanes [IN:IN+H]
    Returns y_p: (T_pad, B_pad, K) where y_p[t] is the packed h[t+1].
    """
    T_pad, B_pad, K = x_seq_p.shape
    grid = (B_pad // b_tile, T_pad // t_chunk)

    # Resident weight: fetched once (constant index_map).  When it is big
    # enough to matter against v7x's 64 MiB VMEM (32 MiB default scoped),
    # drop its default double buffering — one buffer suffices since its block
    # index never changes.
    w_bytes = K * K * w.dtype.itemsize
    if w_bytes > 8 * 1024 * 1024:
        w_spec = pl.BlockSpec((K, K), lambda bi, ti: (0, 0),
                              pipeline_mode=pl.Buffered(1))
    else:
        w_spec = pl.BlockSpec((K, K), lambda bi, ti: (0, 0))

    return pl.pallas_call(
        _rnn_rollout_kernel,
        out_shape=jax.ShapeDtypeStruct((T_pad, B_pad, K), x_seq_p.dtype),
        grid_spec=pltpu.PrefetchScalarGridSpec(
            num_scalar_prefetch=0,
            grid=grid,
            in_specs=[
                pl.BlockSpec((t_chunk, b_tile, K), lambda bi, ti: (ti, bi, 0)),
                pl.BlockSpec((b_tile, K), lambda bi, ti: (bi, 0)),  # h0 (resident)
                w_spec,                                             # weights (resident)
                pl.BlockSpec((1, K), lambda bi, ti: (0, 0)),        # bias (resident)
            ],
            out_specs=pl.BlockSpec((t_chunk, b_tile, K),
                                   lambda bi, ti: (ti, bi, 0)),
            scratch_shapes=[pltpu.VMEM((b_tile, K), jnp.float32)],  # hidden carry
        ),
        compiler_params=pltpu.CompilerParams(
            # batch blocks are independent (megacore on v7x); time is a
            # sequential recurrence.
            dimension_semantics=("parallel", "arbitrary")),
    )(x_seq_p, h0_p, w, b)


def _padded_rollout(x_seq, h0, w, b, *, in_features, hidden_features, k_pack,
                    t_chunk_max, b_tile_max, dtype):
    """Pad/pack -> fused pallas_call -> crop, all inside one jit."""
    T, B, _ = x_seq.shape
    t_chunk = min(t_chunk_max, T)
    T_pad = _round_up(T, t_chunk)
    B_pad = _round_up(max(B, SUBLANE), SUBLANE)
    b_tile = min(b_tile_max, B_pad)
    B_pad = _round_up(B_pad, b_tile)

    x_p = jnp.zeros((T_pad, B_pad, k_pack), dtype)
    x_p = x_p.at[:T, :B, :in_features].set(x_seq.astype(dtype))

    if h0 is None:
        h0_p = jnp.zeros((B_pad, k_pack), dtype)
    elif h0.shape == (B_pad, k_pack):
        h0_p = h0.astype(dtype)          # packed carry from a previous call
    else:
        # User-supplied unpadded (B0, H) initial state: embed into packed lanes.
        h0_p = jnp.zeros((B_pad, k_pack), dtype)
        h0_p = h0_p.at[:h0.shape[0],
                       in_features:in_features + hidden_features].set(
            h0.astype(dtype))

    y_p = rnn_rollout_pallas(x_p, h0_p, w, b, t_chunk=t_chunk, b_tile=b_tile)
    y = y_p[:T, :B, in_features:in_features + hidden_features]
    h_last = y_p[T - 1]                  # packed (B_pad, K) carry == h[T]
    return y, h_last


class WrappedRecurrentCell:
    """The 'wrapped_module': forward(x[, h]) -> (y, h_new) with y == h_new."""

    def __init__(self, in_features, hidden_features, key, dtype=jnp.float32,
                 matmul_dtype=None, t_chunk=8, b_tile=256):
        self.in_features = in_features
        self.hidden_features = hidden_features
        self.dtype = dtype
        matmul_dtype = dtype if matmul_dtype is None else matmul_dtype

        # Joint packing: K = round_up(IN + H, 128) — NOT 128 for each of IN, H.
        self.k_pack = _round_up(in_features + hidden_features, LANE)
        # TODO(synk): for IN+H >> 128 a rectangular (K, round_up(H,128)) weight
        # with a lane-offset carry write would waste less N; not needed here.

        k1, k2, k3 = jax.random.split(key, 3)
        scale = 1.0 / jnp.sqrt(jnp.float32(hidden_features))
        w_ih = (jax.random.normal(k1, (in_features, hidden_features)) * scale
                ).astype(jnp.float32)
        w_hh = (jax.random.normal(k2, (hidden_features, hidden_features)) * scale
                ).astype(jnp.float32)
        bias = (jax.random.normal(k3, (hidden_features,)) * scale
                ).astype(jnp.float32)

        # Unpadded copies (pure-JAX reference check only).
        self.w_ih, self.w_hh, self.b = w_ih, w_hh, bias

        IN, H = in_features, hidden_features
        w_packed = jnp.zeros((self.k_pack, self.k_pack), matmul_dtype)
        w_packed = w_packed.at[:IN, IN:IN + H].set(w_ih.astype(matmul_dtype))
        w_packed = w_packed.at[IN:IN + H, IN:IN + H].set(w_hh.astype(matmul_dtype))
        self.w_packed = w_packed
        # Bias / elementwise math stay f32 (no bf16 VPU/EUP on v5e).
        self.b_packed = jnp.zeros((1, self.k_pack), jnp.float32
                                  ).at[0, IN:IN + H].set(bias)

        self._rollout_fn = jax.jit(functools.partial(
            _padded_rollout,
            in_features=in_features, hidden_features=hidden_features,
            k_pack=self.k_pack, t_chunk_max=t_chunk, b_tile_max=b_tile,
            dtype=dtype))

    # ---- per-step interface (what StatefulModule.forward uses) ----
    def __call__(self, x, h=None):
        y_seq, h_new = self._rollout_fn(x[None], h, self.w_packed, self.b_packed)
        return y_seq[0], h_new

    # ---- fused rollout: a whole (T, B, IN) sequence in one pallas_call ----
    def rollout(self, x_seq, h=None):
        return self._rollout_fn(x_seq, h, self.w_packed, self.b_packed)


class StatefulModule:
    """JAX/Pallas port of evotorch's StatefulModule wrapper (same semantics)."""

    def __init__(self, wrapped_module):
        self._hidden = None
        self.wrapped_module = wrapped_module

    def forward(self, x):
        if self._hidden is None:
            out = self.wrapped_module(x)
        else:
            out = self.wrapped_module(x, self._hidden)
        if isinstance(out, tuple):
            y, self._hidden = out
        else:
            y = out
            self._hidden = None
        return y

    __call__ = forward

    def reset(self):
        self._hidden = None

    # Extension (perf path): feed a whole (T, B, IN) sequence through a single
    # fused pallas_call — same math as T successive forward() calls.
    def forward_sequence(self, x_seq):
        y_seq, self._hidden = self.wrapped_module.rollout(x_seq, self._hidden)
        return y_seq


if __name__ == "__main__":
    key = jax.random.PRNGKey(0)
    k_mod, k_x = jax.random.split(key)

    T, B, IN, H = 8, 8, 32, 32
    cell = WrappedRecurrentCell(IN, H, k_mod)
    module = StatefulModule(cell)

    x_seq = jax.random.normal(k_x, (T, B, IN), dtype=jnp.float32)

    # Path 1: original StatefulModule semantics — one forward() per timestep,
    # hidden state stored/reused by the wrapper.
    ys_step = jnp.stack([module(x_seq[t]) for t in range(T)])

    # Path 2: fused rollout — all T timesteps in one pallas_call.
    module.reset()
    ys_fused = module.forward_sequence(x_seq)

    # Path 3: reset() clears the hidden state.
    module.reset()
    y_after_reset = module(x_seq[0])

    jax.block_until_ready((ys_step, ys_fused, y_after_reset))

    # Pure-JAX reference (same math, no Pallas, no packing/padding).
    h = jnp.zeros((B, H), jnp.float32)
    ys_ref = []
    for t in range(T):
        h = jnp.tanh(x_seq[t] @ cell.w_ih + h @ cell.w_hh + cell.b)
        ys_ref.append(h)
    ys_ref = jnp.stack(ys_ref)

    assert jnp.allclose(ys_step, ys_ref, atol=1e-5, rtol=1e-5)
    assert jnp.allclose(ys_fused, ys_ref, atol=1e-5, rtol=1e-5)
    assert jnp.allclose(y_after_reset, ys_ref[0], atol=1e-5, rtol=1e-5)

    print("KERNEL_OK")
</pallas_src>

<mosaic_0001>
module attributes {stable_mosaic.version = 11 : i64} {
  func.func @_rnn_rollout_kernel(%arg0: i32, %arg1: i32, %arg2: memref<1x8x128xf32, #tpu.memory_space<vmem>>, %arg3: memref<8x128xf32, #tpu.memory_space<vmem>>, %arg4: memref<128x128xf32, #tpu.memory_space<vmem>>, %arg5: memref<1x128xf32, #tpu.memory_space<vmem>>, %arg6: memref<1x8x128xf32, #tpu.memory_space<vmem>>, %arg7: memref<8x128xf32, #tpu.memory_space<vmem>>) attributes {dimension_semantics = [#tpu.dimension_semantics<parallel>, #tpu.dimension_semantics<arbitrary>], iteration_bounds = array<i64: 1, 1>, scalar_prefetch = 0 : i64, scratch_operands = 1 : i64, tpu.core_type = #tpu.core_type<tc>, window_params = [{transform_indices = @transform_0, window_bounds = array<i64: 1, 8, 128>}, {transform_indices = @transform_1, window_bounds = array<i64: 8, 128>}, {pipeline_mode = #tpu.pipeline_mode<synchronous>, transform_indices = @transform_2, window_bounds = array<i64: 128, 128>}, {pipeline_mode = #tpu.pipeline_mode<synchronous>, transform_indices = @transform_3, window_bounds = array<i64: 1, 128>}, {transform_indices = @transform_4, window_bounds = array<i64: 1, 8, 128>}]} {
    %c0_i32 = arith.constant 0 : i32
    %0 = arith.cmpi eq, %arg1, %c0_i32 : i32
    %1 = arith.extui %0 : i1 to i32
    %c0_i32_0 = arith.constant 0 : i32
    %2 = arith.cmpi ne, %1, %c0_i32_0 : i32
    scf.if %2 {
      %c0_13 = arith.constant 0 : index
      %c0_14 = arith.constant 0 : index
      %19 = vector.load %arg3[%c0_13, %c0_14] : memref<8x128xf32, #tpu.memory_space<vmem>>, vector<8x128xf32>
      %c0_15 = arith.constant 0 : index
      %c0_16 = arith.constant 0 : index
      %20 = vector.load %arg7[%c0_15, %c0_16] : memref<8x128xf32, #tpu.memory_space<vmem>>, vector<8x128xf32>
      tpu.vector_store %arg7[%c0_15, %c0_16], %19 {strides = array<i32>} : memref<8x128xf32, #tpu.memory_space<vmem>>, vector<8x128xf32>,
    } else {
    }
    %c0 = arith.constant 0 : index
    %c0_1 = arith.constant 0 : index
    %3 = vector.load %arg4[%c0, %c0_1] : memref<128x128xf32, #tpu.memory_space<vmem>>, vector<128x128xf32>
    %c0_2 = arith.constant 0 : index
    %c0_3 = arith.constant 0 : index
    %4 = vector.load %arg5[%c0_2, %c0_3] : memref<1x128xf32, #tpu.memory_space<vmem>>, vector<1x128xf32>
    %c0_4 = arith.constant 0 : index
    %c0_5 = arith.constant 0 : index
    %5 = vector.load %arg7[%c0_4, %c0_5] : memref<8x128xf32, #tpu.memory_space<vmem>>, vector<8x128xf32>
    %c0_i32_6 = arith.constant 0 : i32
    %6 = arith.index_cast %c0_i32_6 : i32 to index
    %c0_7 = arith.constant 0 : index
    %c0_8 = arith.constant 0 : index
    %7 = vector.load %arg2[%6, %c0_7, %c0_8] : memref<1x8x128xf32, #tpu.memory_space<vmem>>, vector<1x8x128xf32>
    %8 = vector.shape_cast %7 : vector<1x8x128xf32> to vector<8x128xf32>
    %9 = arith.addf %8, %5 : vector<8x128xf32>
    %cst = arith.constant dense<0.000000e+00> : vector<8x128xf32>
    %10 = tpu.matmul %9, %3, %cst {dimension_numbers = #tpu.dot_dimension_numbers<[1], [0], [0], [1], [0, 0, 1, 1], [], []>} : vector<8x128xf32>, vector<128x128xf32>, vector<8x128xf32> -> vector<8x128xf32>
    %11 = vector.broadcast %4 : vector<1x128xf32> to vector<8x128xf32>
    %12 = arith.addf %10, %11 : vector<8x128xf32>
    %13 = math.tanh %12 : vector<8x128xf32>
    %14 = arith.index_cast %c0_i32_6 : i32 to index
    %c0_9 = arith.constant 0 : index
    %c0_10 = arith.constant 0 : index
    %15 = vector.load %arg6[%14, %c0_9, %c0_10] : memref<1x8x128xf32, #tpu.memory_space<vmem>>, vector<1x8x128xf32>
    %16 = vector.shape_cast %15 : vector<1x8x128xf32> to vector<8x128xf32>
    %17 = vector.shape_cast %13 : vector<8x128xf32> to vector<1x8x128xf32>
    tpu.vector_store %arg6[%14, %c0_9, %c0_10], %17 {strides = array<i32>} : memref<1x8x128xf32, #tpu.memory_space<vmem>>, vector<1x8x128xf32>,
    %c1_i32 = arith.constant 1 : i32
    %c0_11 = arith.constant 0 : index
    %c0_12 = arith.constant 0 : index
    %18 = vector.load %arg7[%c0_11, %c0_12] : memref<8x128xf32, #tpu.memory_space<vmem>>, vector<8x128xf32>
    tpu.vector_store %arg7[%c0_11, %c0_12], %13 {strides = array<i32>} : memref<8x128xf32, #tpu.memory_space<vmem>>, vector<8x128xf32>,
    return
  }
  func.func @transform_0(%arg0: i32, %arg1: i32) -> (i32, i32, i32) {
    %c0_i32 = arith.constant 0 : i32
    %c0_i32_0 = arith.constant 0 : i32
    return %arg1, %arg0, %c0_i32 : i32, i32, i32
  }
  func.func @transform_1(%arg0: i32, %arg1: i32) -> (i32, i32) {
    %c0_i32 = arith.constant 0 : i32
    %c0_i32_0 = arith.constant 0 : i32
    return %arg0, %c0_i32 : i32, i32
  }
  func.func @transform_2(%arg0: i32, %arg1: i32) -> (i32, i32) {
    %c0_i32 = arith.constant 0 : i32
    %c0_i32_0 = arith.constant 0 : i32
    %c0_i32_1 = arith.constant 0 : i32
    return %c0_i32, %c0_i32_0 : i32, i32
  }
  func.func @transform_3(%arg0: i32, %arg1: i32) -> (i32, i32) {
    %c0_i32 = arith.constant 0 : i32
    %c0_i32_0 = arith.constant 0 : i32
    %c0_i32_1 = arith.constant 0 : i32
    return %c0_i32, %c0_i32_0 : i32, i32
  }
  func.func @transform_4(%arg0: i32, %arg1: i32) -> (i32, i32, i32) {
    %c0_i32 = arith.constant 0 : i32
    %c0_i32_0 = arith.constant 0 : i32
    return %arg1, %arg0, %c0_i32 : i32, i32, i32
  }
}

</mosaic_0001>

<bundles_post_ra>
// kernel: _padded_rollout.1
= control target key start
LH: loop header
LB: loop body
LE: loop exit
PB: predicated region body
PF: predicated region fallthrough
CT: control target
= control target key end

     0   :  { %9 = vsyncpa [#allocation4], 0  ;;  %s223_s15 = smov [#allocation3]   ;;  %s268_s0 = inlined_call_operand.vmem [shape: f32[1,8,128], index: 0, kind: input, shape index: {}]   ;;  %s269_s1 = inlined_call_operand.vmem [shape: f32[8,128], index: 1, kind: input, shape index: {}]   ;;  %s270_s2 = inlined_call_operand.hbm [shape: f32[128,128], index: 2, kind: input, shape index: {}]   ;;  %s271_s3 = inlined_call_operand.vmem [shape: f32[1,128], index: 3, kind: input, shape index: {}]   ;;  %s272_s4 = inlined_call_operand.vmem [shape: f32[1,8,128], index: 4, kind: output, shape index: {}]  }
   0x1   :  { %s19_s16 = sshll.u32 %s223_s15, 4  ;;  %s20_s16 = int_to_ptr.vmem [resolvable:$true] %s19_s16 }
   0x2   :  { %s209_s17 = scalar_lea.vmem %s20_s16, 2048  ;;  %p214_p1 = scmp.lt.s32.totalorder %s20_s16, %s20_s16 }
   0x3   :  { %p210_p0 = scmp.ne.s32.totalorder %s20_s16, %s209_s17  ;;  %p215_p2 = scmp.lt.s32.totalorder %s209_s17, %s209_s17 }
   0x5   :  { %p216_p3 = por %p215_p2, %p214_p1 }
   0x7   :  { %p217_p4 = pnand %p216_p3, %p210_p0 }
   0x9   :  { %220 = shalt.err (!%p217_p4)
}
   0xa   :  { %s224_s18 = smov 128   ;;  %s225_s19 = smov 8  }
   0xb   :  { %25 = dma.hbm_to_vmem [thread:$0]  %s270_s2, 2048, %s20_s16, [#allocation4], %s224_s18, %s224_s18, %s225_s19  }
   0xc   :  { %221 = dma.done.wait [#allocation4], 2048  }
   0xd   :  { %222 = vsyncadd [#allocation4], 4294965248  ;;  %v226_v0 = vmov 0.0   ;;  %vm227_vm0 = vmmov 0   ;;  %v52_v1 = vld [vmem:[#allocation3 + $0x78] sm:$0xff]  ;;  %v51_v2 = vld [vmem:[#allocation3 + $0x70] sm:$0xff] }
   0xe   :  { %159 = vmatprep.subr.mxu0 %v226_v0  ;;  %191 = vmatprep.mubr.msk.f32.mxu0 %vm227_vm0, %v226_v0  ;;  %v50_v3 = vld [vmem:[#allocation3 + $0x68] sm:$0xff]  ;;  %v49_v4 = vld [vmem:[#allocation3 + $0x60] sm:$0xff]  ;;  %v48_v5 = vld [vmem:[#allocation3 + $0x58] sm:$0xff] }
   0xf   :  { %160 = vmatpush3.msra.mxu0 %v52_v1  ;;  %v47_v6 = vld [vmem:[#allocation3 + $0x50] sm:$0xff]  ;;  %v46_v7 = vld [vmem:[#allocation3 + $0x48] sm:$0xff]  ;;  %v45_v8 = vld [vmem:[#allocation3 + $0x40] sm:$0xff] }
  0x10   :  { %161 = vmatprep.subr.mxu0 %v226_v0  ;;  %v44_v9 = vld [vmem:[#allocation3 + $0x38] sm:$0xff]  ;;  %v43_v10 = vld [vmem:[#allocation3 + $0x30] sm:$0xff]  ;;  %v42_v11 = vld [vmem:[#allocation3 + $0x28] sm:$0xff] }
  0x11   :  { %162 = vmatpush3.msra.mxu0 %v51_v2  ;;  %v41_v12 = vld [vmem:[#allocation3 + $0x20] sm:$0xff]  ;;  %v40_v13 = vld [vmem:[#allocation3 + $0x18] sm:$0xff]  ;;  %v39_v14 = vld [vmem:[#allocation3 + $0x10] sm:$0xff] }
  0x12   :  { %163 = vmatprep.subr.mxu0 %v226_v0  ;;  %v35_v15 = vld [vmem:[%s269_s1] sm:$0xff]  ;;  %v38_v17 = vld [vmem:[#allocation3 + $0x8] sm:$0xff] }
  0x13   :  { %164 = vmatpush3.msra.mxu0 %v50_v3  ;;  %v55_v16 = vld [vmem:[%s268_s0] sm:$0xff] }
  0x14   :  { %165 = vmatprep.subr.mxu0 %v226_v0  ;;  %v37_v18 = vld [vmem:[#allocation3] sm:$0xff]  ;;  %v56_v19 = vadd.f32 %v55_v16, %v35_v15 }
  0x15   :  { %166 = vmatpush3.msra.mxu0 %v49_v4  ;;  %v141_v20 = vld [vmem:[%s271_s3] ss:$0 sm:$0xff] }
  0x16   :  { %167 = vmatprep.subr.mxu0 %v226_v0 }
  0x17   :  { %168 = vmatpush3.msra.mxu0 %v48_v5 }
  0x18   :  { %169 = vmatprep.subr.mxu0 %v226_v0 }
  0x19   :  { %170 = vmatpush3.msra.mxu0 %v47_v6 }
  0x1a   :  { %171 = vmatprep.subr.mxu0 %v226_v0 }
  0x1b   :  { %172 = vmatpush3.msra.mxu0 %v46_v7 }
  0x1c   :  { %173 = vmatprep.subr.mxu0 %v226_v0 }
  0x1d   :  { %174 = vmatpush3.msra.mxu0 %v45_v8 }
  0x1e   :  { %175 = vmatprep.subr.mxu0 %v226_v0 }
  0x1f   :  { %176 = vmatpush3.msra.mxu0 %v44_v9 }
  0x20   :  { %177 = vmatprep.subr.mxu0 %v226_v0 }
  0x21   :  { %178 = vmatpush3.msra.mxu0 %v43_v10 }
  0x22   :  { %179 = vmatprep.subr.mxu0 %v226_v0 }
  0x23   :  { %180 = vmatpush3.msra.mxu0 %v42_v11 }
  0x24   :  { %181 = vmatprep.subr.mxu0 %v226_v0 }
  0x25   :  { %182 = vmatpush3.msra.mxu0 %v41_v12 }
  0x26   :  { %183 = vmatprep.subr.mxu0 %v226_v0 }
  0x27   :  { %184 = vmatpush3.msra.mxu0 %v40_v13 }
  0x28   :  { %185 = vmatprep.subr.mxu0 %v226_v0 }
  0x29   :  { %186 = vmatpush3.msra.mxu0 %v39_v14 }
  0x2a   :  { %187 = vmatprep.subr.mxu0 %v226_v0 }
  0x2b   :  { %188 = vmatpush3.msra.mxu0 %v38_v17 }
  0x2c   :  { %189 = vmatprep.subr.mxu0 %v226_v0 }
  0x2d   :  { %190 = vmatpush3.msra.mxu0 %v37_v18 }
  0x2e   :  { %192 = vmatmul.mubr.f32.vlgmr.msra.gmra.mxu0 %v56_v19 }
  0xee   :  { %v129_v21 = vpop.f32.mrf.mxu0 }
  0xef   :  { %v130_v22 = vadd.f32 %v141_v20, %v129_v21 }
  0xf0   :  { %v193_v23 = vpop.f32.mrf.mxu0 }
  0xf1   :  { %199 = vtanh.f32 %v130_v22 }
  0xfe   :  { %v200_v24 = vpop.eup %199 }
  0xff   :  { %134 = vst [vmem:[%s272_s4] sm:$0xff] %v200_v24 }
 0x100   :  { %140 = vsyncpa [#allocation4], 1 }

</bundles_post_ra>
